<compile_context>
chip_gen: v5e
topology: v5e:2x2
jax: 0.10.0
libtpu: 0.0.40
codegen_flags: <defaults>
</compile_context>

<pallas_src>
import functools

import jax
import jax.numpy as jnp
from jax.experimental import pallas as pl
from jax.experimental.pallas import tpu as pltpu


def _fc_bn_elu_kernel(x_ref, wt_ref, b_ref, g_ref, beta_ref, o_ref, acc_ref, *, eps):
    """One (n, k) grid step: accumulate x_tile @ wT_tile; BN + ELU epilogue on last k."""
    k = pl.program_id(1)

    @pl.when(k == 0)
    def _init():
        acc_ref[...] = jnp.zeros_like(acc_ref)

    # MXU matmul with f32 accumulation.
    acc_ref[...] += jnp.dot(
        x_ref[...], wt_ref[...], preferred_element_type=jnp.float32
    )

    @pl.when(k == pl.num_programs(1) - 1)
    def _epilogue():
        z = acc_ref[...] + b_ref[...].astype(jnp.float32)          # (B, tn)
        # BatchNorm1d in training mode: biased batch statistics over axis 0.
        mu = jnp.mean(z, axis=0, keepdims=True)                     # (1, tn)
        var = jnp.mean(jnp.square(z - mu), axis=0, keepdims=True)   # (1, tn)
        zhat = (z - mu) * jax.lax.rsqrt(var + eps)
        h = zhat * g_ref[...].astype(jnp.float32) + beta_ref[...].astype(jnp.float32)
        # ELU (alpha = 1.0).
        y = jnp.where(h > 0, h, jnp.exp(h) - 1.0)
        o_ref[...] = y.astype(o_ref.dtype)


def _pick_tile(dim, preferred):
    """Largest multiple-of-128 divisor of `dim` that is <= preferred, else full dim."""
    if dim % 128 == 0:
        t = min(preferred, dim)
        t -= t % 128
        while dim % t != 0:
            t -= 128
        return t
    return dim  # full-extent block is always legal


def fully_connected_block(x, weight, bias, gamma, beta, *, eps=1e-5):
    """Fused forward of FullyConnectedBlock.

    x:      (B, in_dim)
    weight: (out_dim, in_dim)   -- torch nn.Linear layout
    bias:   (out_dim,)
    gamma:  (out_dim,)          -- BatchNorm1d weight
    beta:   (out_dim,)          -- BatchNorm1d bias
    returns (B, out_dim)
    """
    B, K = x.shape
    N = weight.shape[0]

    # Layout glue (outside the kernel): present RHS as (K, N) and the 1-D
    # per-feature params as lane-dense (1, N) rows.
    wt = jnp.transpose(weight)            # (K, N)
    b2 = jnp.reshape(bias, (1, N))
    g2 = jnp.reshape(gamma, (1, N))
    beta2 = jnp.reshape(beta, (1, N))

    # Tile sizes: lane-dense, sized well below scoped VMEM on all generations
    # (v5e 16 MiB / v6e 32 MiB / v7x 32 MiB default).  B stays whole so the
    # batch-norm reduction sees the full batch.
    tn = _pick_tile(N, 512)
    tk = _pick_tile(K, 512)
    grid = (N // tn, K // tk)

    kernel = functools.partial(_fc_bn_elu_kernel, eps=eps)

    return pl.pallas_call(
        kernel,
        out_shape=jax.ShapeDtypeStruct((B, N), x.dtype),
        grid_spec=pltpu.PrefetchScalarGridSpec(
            num_scalar_prefetch=0,
            grid=grid,
            in_specs=[
                pl.BlockSpec((B, tk), lambda j, k: (0, k)),   # x
                pl.BlockSpec((tk, tn), lambda j, k: (k, j)),  # W^T
                pl.BlockSpec((1, tn), lambda j, k: (0, j)),   # bias
                pl.BlockSpec((1, tn), lambda j, k: (0, j)),   # gamma
                pl.BlockSpec((1, tn), lambda j, k: (0, j)),   # beta
            ],
            out_specs=pl.BlockSpec((B, tn), lambda j, k: (0, j)),
            scratch_shapes=[pltpu.VMEM((B, tn), jnp.float32)],
        ),
        compiler_params=pltpu.CompilerParams(
            dimension_semantics=("parallel", "arbitrary"),
        ),
    )(x, wt, b2, g2, beta2)


if __name__ == "__main__":
    key = jax.random.PRNGKey(0)
    B, in_dim, out_dim = 8, 64, 32
    kx, kw, kb, kg, kbt = jax.random.split(key, 5)

    x = jax.random.normal(kx, (B, in_dim), dtype=jnp.float32)
    weight = jax.random.normal(kw, (out_dim, in_dim), dtype=jnp.float32) * 0.1
    bias = jax.random.normal(kb, (out_dim,), dtype=jnp.float32) * 0.1
    gamma = 1.0 + 0.1 * jax.random.normal(kg, (out_dim,), dtype=jnp.float32)
    beta = 0.1 * jax.random.normal(kbt, (out_dim,), dtype=jnp.float32)

    y = fully_connected_block(x, weight, bias, gamma, beta)
    y = jax.block_until_ready(y)

    # Pure-JAX reference (training-mode BatchNorm1d + ELU, matching torch defaults).
    eps = 1e-5
    z = x @ weight.T + bias
    mu = jnp.mean(z, axis=0, keepdims=True)
    var = jnp.mean((z - mu) ** 2, axis=0, keepdims=True)
    h = (z - mu) / jnp.sqrt(var + eps) * gamma + beta
    y_ref = jnp.where(h > 0, h, jnp.exp(h) - 1.0)

    assert y.shape == (B, out_dim), y.shape
    assert y.dtype == x.dtype
    assert jnp.allclose(y, y_ref, atol=1e-5, rtol=1e-5), float(jnp.max(jnp.abs(y - y_ref)))

    # TODO(synk): BatchNorm1d running_mean/running_var buffer updates (a
    # training-time side effect, not part of the returned forward value) are
    # not emitted by this kernel.

    print("KERNEL_OK")
</pallas_src>

<mosaic_0001>
module attributes {stable_mosaic.version = 11 : i64} {
  func.func @_fc_bn_elu_kernel(%arg0: i32, %arg1: i32, %arg2: memref<8x64xf32, #tpu.memory_space<vmem>>, %arg3: memref<64x32xf32, #tpu.memory_space<vmem>>, %arg4: memref<1x32xf32, #tpu.memory_space<vmem>>, %arg5: memref<1x32xf32, #tpu.memory_space<vmem>>, %arg6: memref<1x32xf32, #tpu.memory_space<vmem>>, %arg7: memref<8x32xf32, #tpu.memory_space<vmem>>, %arg8: memref<8x32xf32, #tpu.memory_space<vmem>>) attributes {dimension_semantics = [#tpu.dimension_semantics<parallel>, #tpu.dimension_semantics<arbitrary>], iteration_bounds = array<i64: 1, 1>, scalar_prefetch = 0 : i64, scratch_operands = 1 : i64, tpu.core_type = #tpu.core_type<tc>, window_params = [{transform_indices = @transform_0, window_bounds = array<i64: 8, 64>}, {transform_indices = @transform_1, window_bounds = array<i64: 64, 32>}, {transform_indices = @transform_2, window_bounds = array<i64: 1, 32>}, {transform_indices = @transform_3, window_bounds = array<i64: 1, 32>}, {transform_indices = @transform_4, window_bounds = array<i64: 1, 32>}, {transform_indices = @transform_5, window_bounds = array<i64: 8, 32>}]} {
    %c0_i32 = arith.constant 0 : i32
    %0 = arith.cmpi eq, %arg1, %c0_i32 : i32
    %1 = arith.extui %0 : i1 to i32
    %c0_i32_0 = arith.constant 0 : i32
    %2 = arith.cmpi ne, %1, %c0_i32_0 : i32
    scf.if %2 {
      %cst_10 = arith.constant 0.000000e+00 : f32
      %12 = vector.broadcast %cst_10 : f32 to vector<8x32xf32>
      %c0_11 = arith.constant 0 : index
      %c0_12 = arith.constant 0 : index
      %13 = vector.load %arg8[%c0_11, %c0_12] : memref<8x32xf32, #tpu.memory_space<vmem>>, vector<8x32xf32>
      tpu.vector_store %arg8[%c0_11, %c0_12], %12 {strides = array<i32>} : memref<8x32xf32, #tpu.memory_space<vmem>>, vector<8x32xf32>,
    } else {
    }
    %c0 = arith.constant 0 : index
    %c0_1 = arith.constant 0 : index
    %3 = vector.load %arg8[%c0, %c0_1] : memref<8x32xf32, #tpu.memory_space<vmem>>, vector<8x32xf32>
    %c0_2 = arith.constant 0 : index
    %c0_3 = arith.constant 0 : index
    %4 = vector.load %arg2[%c0_2, %c0_3] : memref<8x64xf32, #tpu.memory_space<vmem>>, vector<8x64xf32>
    %c0_4 = arith.constant 0 : index
    %c0_5 = arith.constant 0 : index
    %5 = vector.load %arg3[%c0_4, %c0_5] : memref<64x32xf32, #tpu.memory_space<vmem>>, vector<64x32xf32>
    %cst = arith.constant dense<0.000000e+00> : vector<8x32xf32>
    %6 = tpu.matmul %4, %5, %cst {dimension_numbers = #tpu.dot_dimension_numbers<[1], [0], [0], [1], [0, 0, 1, 1], [], []>} : vector<8x64xf32>, vector<64x32xf32>, vector<8x32xf32> -> vector<8x32xf32>
    %7 = arith.addf %3, %6 : vector<8x32xf32>
    %c0_6 = arith.constant 0 : index
    %c0_7 = arith.constant 0 : index
    %8 = vector.load %arg8[%c0_6, %c0_7] : memref<8x32xf32, #tpu.memory_space<vmem>>, vector<8x32xf32>
    tpu.vector_store %arg8[%c0_6, %c0_7], %7 {strides = array<i32>} : memref<8x32xf32, #tpu.memory_space<vmem>>, vector<8x32xf32>,
    %c0_i32_8 = arith.constant 0 : i32
    %9 = arith.cmpi eq, %arg1, %c0_i32_8 : i32
    %10 = arith.extui %9 : i1 to i32
    %c0_i32_9 = arith.constant 0 : i32
    %11 = arith.cmpi ne, %10, %c0_i32_9 : i32
    scf.if %11 {
      %c0_10 = arith.constant 0 : index
      %c0_11 = arith.constant 0 : index
      %12 = vector.load %arg8[%c0_10, %c0_11] : memref<8x32xf32, #tpu.memory_space<vmem>>, vector<8x32xf32>
      %c0_12 = arith.constant 0 : index
      %c0_13 = arith.constant 0 : index
      %13 = vector.load %arg4[%c0_12, %c0_13] : memref<1x32xf32, #tpu.memory_space<vmem>>, vector<1x32xf32>
      %14 = vector.broadcast %13 : vector<1x32xf32> to vector<8x32xf32>
      %15 = arith.addf %12, %14 : vector<8x32xf32>
      %cst_14 = arith.constant dense<0.000000e+00> : vector<32xf32>
      %16 = vector.multi_reduction <add>, %15, %cst_14 [0] : vector<8x32xf32> to vector<32xf32>
      %17 = vector.shape_cast %16 : vector<32xf32> to vector<1x32xf32>
      %cst_15 = arith.constant 8.000000e+00 : f32
      %18 = vector.broadcast %cst_15 : f32 to vector<1x32xf32>
      %19 = arith.divf %17, %18 : vector<1x32xf32>
      %20 = vector.broadcast %19 : vector<1x32xf32> to vector<8x32xf32>
      %21 = arith.subf %15, %20 : vector<8x32xf32>
      %22 = arith.mulf %21, %21 : vector<8x32xf32>
      %cst_16 = arith.constant dense<0.000000e+00> : vector<32xf32>
      %23 = vector.multi_reduction <add>, %22, %cst_16 [0] : vector<8x32xf32> to vector<32xf32>
      %24 = vector.shape_cast %23 : vector<32xf32> to vector<1x32xf32>
      %cst_17 = arith.constant 8.000000e+00 : f32
      %25 = vector.broadcast %cst_17 : f32 to vector<1x32xf32>
      %26 = arith.divf %24, %25 : vector<1x32xf32>
      %27 = vector.broadcast %19 : vector<1x32xf32> to vector<8x32xf32>
      %28 = arith.subf %15, %27 : vector<8x32xf32>
      %cst_18 = arith.constant 9.99999974E-6 : f32
      %29 = vector.broadcast %cst_18 : f32 to vector<1x32xf32>
      %30 = arith.addf %26, %29 : vector<1x32xf32>
      %31 = math.rsqrt %30 : vector<1x32xf32>
      %32 = vector.broadcast %31 : vector<1x32xf32> to vector<8x32xf32>
      %33 = arith.mulf %28, %32 : vector<8x32xf32>
      %c0_19 = arith.constant 0 : index
      %c0_20 = arith.constant 0 : index
      %34 = vector.load %arg5[%c0_19, %c0_20] : memref<1x32xf32, #tpu.memory_space<vmem>>, vector<1x32xf32>
      %35 = vector.broadcast %34 : vector<1x32xf32> to vector<8x32xf32>
      %36 = arith.mulf %33, %35 : vector<8x32xf32>
      %c0_21 = arith.constant 0 : index
      %c0_22 = arith.constant 0 : index
      %37 = vector.load %arg6[%c0_21, %c0_22] : memref<1x32xf32, #tpu.memory_space<vmem>>, vector<1x32xf32>
      %38 = vector.broadcast %37 : vector<1x32xf32> to vector<8x32xf32>
      %39 = arith.addf %36, %38 : vector<8x32xf32>
      %cst_23 = arith.constant 0.000000e+00 : f32
      %40 = vector.broadcast %cst_23 : f32 to vector<8x32xf32>
      %41 = arith.cmpf ogt, %39, %40 : vector<8x32xf32>
      %42 = math.exp %39 : vector<8x32xf32>
      %cst_24 = arith.constant 1.000000e+00 : f32
      %43 = vector.broadcast %cst_24 : f32 to vector<8x32xf32>
      %44 = arith.subf %42, %43 : vector<8x32xf32>
      %45 = arith.select %41, %39, %44 : vector<8x32xi1>, vector<8x32xf32>
      %c0_25 = arith.constant 0 : index
      %c0_26 = arith.constant 0 : index
      %46 = vector.load %arg7[%c0_25, %c0_26] : memref<8x32xf32, #tpu.memory_space<vmem>>, vector<8x32xf32>
      tpu.vector_store %arg7[%c0_25, %c0_26], %45 {strides = array<i32>} : memref<8x32xf32, #tpu.memory_space<vmem>>, vector<8x32xf32>,
    } else {
    }
    return
  }
  func.func @transform_0(%arg0: i32, %arg1: i32) -> (i32, i32) {
    %c0_i32 = arith.constant 0 : i32
    %c0_i32_0 = arith.constant 0 : i32
    return %c0_i32, %arg1 : i32, i32
  }
  func.func @transform_1(%arg0: i32, %arg1: i32) -> (i32, i32) {
    %c0_i32 = arith.constant 0 : i32
    return %arg1, %arg0 : i32, i32
  }
  func.func @transform_2(%arg0: i32, %arg1: i32) -> (i32, i32) {
    %c0_i32 = arith.constant 0 : i32
    %c0_i32_0 = arith.constant 0 : i32
    return %c0_i32, %arg0 : i32, i32
  }
  func.func @transform_3(%arg0: i32, %arg1: i32) -> (i32, i32) {
    %c0_i32 = arith.constant 0 : i32
    %c0_i32_0 = arith.constant 0 : i32
    return %c0_i32, %arg0 : i32, i32
  }
  func.func @transform_4(%arg0: i32, %arg1: i32) -> (i32, i32) {
    %c0_i32 = arith.constant 0 : i32
    %c0_i32_0 = arith.constant 0 : i32
    return %c0_i32, %arg0 : i32, i32
  }
  func.func @transform_5(%arg0: i32, %arg1: i32) -> (i32, i32) {
    %c0_i32 = arith.constant 0 : i32
    %c0_i32_0 = arith.constant 0 : i32
    return %c0_i32, %arg0 : i32, i32
  }
}

</mosaic_0001>

<bundles_post_ra>
// kernel: tpu_custom_call.1
= control target key start
LH: loop header
LB: loop body
LE: loop exit
PB: predicated region body
PF: predicated region fallthrough
CT: control target
= control target key end

     0   :  { %vm25_vm0 = vcmask 261120   ;;  %v182_v2 = vmov 0.0   ;;  %s259_s0 = inlined_call_operand.vmem [shape: f32[8,64], index: 0, kind: input, shape index: {}]   ;;  %s260_s1 = inlined_call_operand.vmem [shape: f32[64,32], index: 1, kind: input, shape index: {}]   ;;  %s261_s2 = inlined_call_operand.vmem [shape: f32[1,32], index: 2, kind: input, shape index: {}]   ;;  %s262_s3 = inlined_call_operand.vmem [shape: f32[1,32], index: 3, kind: input, shape index: {}]   ;;  %s263_s4 = inlined_call_operand.vmem [shape: f32[1,32], index: 4, kind: input, shape index: {}]   ;;  %s264_s5 = inlined_call_operand.hbm [shape: f32[8,32], index: 5, kind: output, shape index: {}]  }
   0x1   :  { %v36_v0 = vld [vmem:[%s260_s1 + $0x38] sm:$0xff]  ;;  %v35_v1 = vld [vmem:[%s260_s1 + $0x30] sm:$0xff]  ;;  %26 = vst.msk [vmem:[#allocation2] sm:$0xff] %vm25_vm0, %v182_v2  ;;  %v34_v3 = vld [vmem:[%s260_s1 + $0x28] sm:$0xff] }
   0x2   :  { %49 = vmatpush.msra.mxu0 %v36_v0 }
   0x4   :  { %50 = vmatpush.msra.mxu0 %v35_v1 }
   0x5   :  { %10 = vsyncpa [#allocation4], 0  ;;  %v33_v4 = vld [vmem:[%s260_s1 + $0x20] sm:$0xff]  ;;  %v32_v5 = vld [vmem:[%s260_s1 + $0x18] sm:$0xff]  ;;  %vm37_vm1 = vcmask 523264   ;;  %v183_v11 = vmov 8.0  }
   0x6   :  { %51 = vmatpush.msra.mxu0 %v34_v3  ;;  %v31_v6 = vld [vmem:[%s260_s1 + $0x10] sm:$0xff]  ;;  %v30_v7 = vld [vmem:[%s260_s1 + $0x8] sm:$0xff]  ;;  %v29_v8 = vld [vmem:[%s260_s1] sm:$0xff]  ;;  %150 = vrcp.f32 %v183_v11  ;;  %s184_s14 = smov [#allocation3]   ;;  %s133_s18 = sshll.u32 %s264_s5, 4  ;;  %s134_s18 = int_to_ptr.hbm [resolvable:$true] %s133_s18 }
   0x7   :  { %v28_v9 = vld [vmem:[%s259_s0] sm:$0xff]  ;;  %s131_s15 = sshll.u32 %s184_s14, 4  ;;  %s132_s15 = int_to_ptr.vmem [resolvable:$true] %s131_s15 }
   0x8   :  { %52 = vmatpush.msra.mxu0 %v33_v4  ;;  %v27_v10 = vld [vmem:[#allocation2] sm:$0xff] }
   0x9   :  { %v147_v15 = vld [vmem:[%s261_s2] ss:$0 sm:$0xff] }
   0xa   :  { %53 = vmatpush.msra.mxu0 %v32_v5  ;;  %v148_v48 = vld [vmem:[%s262_s3] ss:$0 sm:$0xff] }
   0xb   :  { %v149_v51 = vld [vmem:[%s263_s4] ss:$0 sm:$0xff] }
   0xc   :  { %54 = vmatpush.msra.mxu0 %v31_v6  ;;  %v151_v14 = vpop.eup %150 }
   0xd   :  { %v81_v16 = vmul.f32 8.0, %v151_v14  ;;  %vm85_vm2 = vweird.f32 %v151_v14 }
   0xe   :  { %55 = vmatpush.msra.mxu0 %v30_v7 }
   0xf   :  { %v82_v19 = vsub.f32 1.0, %v81_v16 }
  0x10   :  { %56 = vmatpush.msra.mxu0 %v29_v8 }
  0x11   :  { %142 = vmatmul.msk.f32.vlgmr.msra.gmra.mxu0 %vm37_vm1, %v28_v9  ;;  %v83_v22 = vmul.f32 %v151_v14, %v82_v19 }
  0x13   :  { %v84_v25 = vadd.f32 %v151_v14, %v83_v22 }
  0x15   :  { %v86_v28 = vsel %vm85_vm2, %v151_v14, %v84_v25 }
  0x8e   :  { %v58_v12 = vpop.f32.mrf.mxu0 }
  0x8f   :  { %v61_v13 = vadd.f32 %v58_v12, %v27_v10 }
  0x91   :  { %63 = vst.msk [vmem:[#allocation2] sm:$0xff] %vm25_vm0, %v61_v13 }
  0x98   :  { %v67_v17 = vld [vmem:[#allocation2] sm:$0xff] }
  0x99   :  { %v72_v18 = vadd.f32 %v147_v15, %v67_v17 }
  0x9b   :  { %v73_v20 = vsel %vm25_vm0, %v72_v18, 0.0 }
  0x9c   :  { %v74_v21 = vrot.slane %v73_v20, 4 }
  0x9e   :  { %v75_v23 = vadd.f32 %v74_v21, %v73_v20 }
  0xa0   :  { %v76_v24 = vrot.slane %v75_v23, 2 }
  0xa2   :  { %v77_v26 = vadd.f32 %v76_v24, %v75_v23 }
  0xa4   :  { %v78_v27 = vrot.slane %v77_v26, 1 }
  0xa6   :  { %v79_v29 = vadd.f32 %v78_v27, %v77_v26 }
  0xa8   :  { %v87_v30 = vmul.f32 %v86_v28, %v79_v29 }
  0xaa   :  { %v88_v31 = vsub.f32 %v72_v18, %v87_v30 }
  0xac   :  { %v89_v32 = vmul.f32 %v88_v31, %v88_v31 }
  0xae   :  { %v90_v33 = vsel %vm25_vm0, %v89_v32, 0.0 }
  0xaf   :  { %v91_v34 = vrot.slane %v90_v33, 4 }
  0xb1   :  { %v92_v35 = vadd.f32 %v91_v34, %v90_v33 }
  0xb3   :  { %v93_v36 = vrot.slane %v92_v35, 2 }
  0xb5   :  { %v94_v37 = vadd.f32 %v93_v36, %v92_v35 }
  0xb7   :  { %v95_v38 = vrot.slane %v94_v37, 1 }
  0xb9   :  { %v96_v39 = vadd.f32 %v95_v38, %v94_v37 }
  0xbb   :  { %v97_v40 = vmul.f32 %v96_v39, %v86_v28 }
  0xbd   :  { %v98_v41 = vadd.f32 1e-05, %v97_v40 }
  0xbf   :  { %152 = vrsqrt.f32 %v98_v41  ;;  %vm105_vm4 = vweird.f32 %v98_v41 }
  0xc5   :  { %v153_v42 = vpop.eup %152 }
  0xc6   :  { %v100_v43 = vmul.f32 %v153_v42, %v98_v41  ;;  %vm106_vm3 = vweird.f32 %v153_v42 }
  0xc7   :  { %vm107_vm5 = vmor %vm105_vm4, %vm106_vm3 }
  0xc8   :  { %v101_v44 = vmul.f32 %v153_v42, %v100_v43 }
  0xca   :  { %v102_v45 = vmul.f32 0.5, %v101_v44 }
  0xcc   :  { %v103_v46 = vsub.f32 1.5, %v102_v45 }
  0xce   :  { %v104_v47 = vmul.f32 %v153_v42, %v103_v46 }
  0xd0   :  { %v108_v49 = vsel %vm107_vm5, %v153_v42, %v104_v47 }
  0xd1   :  { %v109_v50 = vmul.f32 %v108_v49, %v88_v31 }
  0xd3   :  { %v114_v52 = vmul.f32 %v148_v48, %v109_v50 }
  0xd5   :  { %v119_v53 = vadd.f32 %v149_v51, %v114_v52 }
  0xd7   :  { %v121_v54 = vmul.f32 1.442695, %v119_v53  ;;  %vm120_vm6 = vcmp.gt.f32.partialorder %v119_v53, 0.0 }
  0xd9   :  { %154 = vpow2.f32 %v121_v54 }
  0xdf   :  { %v155_v55 = vpop.eup %154 }
  0xe0   :  { %v143_v56 = vadd.f32 -1.0, %v155_v55 }
  0xe2   :  { %v124_v57 = vsel %vm120_vm6, %v119_v53, %v143_v56 }
  0xe3   :  { %125 = vst.msk [vmem:[#allocation3] sm:$0xff] %vm25_vm0, %v124_v57 }
  0xe4   :  { %136 = dma.vmem_to_hbm [thread:$0]  %s132_s15, 128, %s134_s18, [#allocation4]  }
  0xe5   :  { %180 = dma.done.wait [#allocation4], 128  }
  0xe6   :  { %181 = vsyncadd [#allocation4], 4294967168 }
  0xe7   :  { %141 = vsyncpa [#allocation4], 1 }

</bundles_post_ra>
